<compile_context>
chip_gen: v7x
topology: tpu7x:2x2x1
jax: 0.10.0
libtpu: 0.0.40
codegen_flags: <defaults>
</compile_context>

<pallas_src>
import functools

import jax
import jax.numpy as jnp
from jax.experimental import pallas as pl
from jax.experimental.pallas import tpu as pltpu


# ---------------------------------------------------------------------------
# VMEM budgeting / tile sizing
# ---------------------------------------------------------------------------

def _vmem_limit_bytes():
    try:
        vmem_cap = pltpu.get_tpu_info().vmem_capacity_bytes   # 128 MiB v5e/v6e, 64 MiB v7x
    except Exception:
        vmem_cap = 64 * 1024 * 1024                           # conservative fallback (v7x)
    return int(min(vmem_cap * 3 // 4, 96 * 1024 * 1024))


def _choose_spatial_tile(num_classes, hw, itemsize, vmem_limit):
    """Lane tile (positions per block) for the (1, C, T) spatial layout."""
    c_pad = ((num_classes + 7) // 8) * 8            # sublane padding in VMEM
    # ~6-8 MiB logits blocks: near the measured HBM-roofline plateau, amortizes the
    # ~0.35us per-step overhead, and leaves room for the double-buffered input DMA plus
    # the f32 in-kernel working set under the scoped limit (48 MiB v7x, 96 MiB v5e/v6e).
    target = min(8 * 1024 * 1024, vmem_limit // 8)
    # per-lane VMEM: 2x input block (double buffer) + ~3 f32 (C, T) temporaries.
    per_lane = c_pad * (2 * itemsize + 12)
    t = min(target // max(1, c_pad * itemsize),
            max(0, vmem_limit - (2 << 20)) // max(1, per_lane))
    t = max(128, (t // 128) * 128)
    hw_ceil = ((hw + 127) // 128) * 128
    return min(t, hw_ceil)


def _choose_row_tile(num_classes, n_rows, itemsize, vmem_limit):
    """Row tile for the (TB, C) classification layout (classes on lanes)."""
    c_pad = ((num_classes + 127) // 128) * 128      # lane padding in VMEM
    target = min(8 * 1024 * 1024, vmem_limit // 8)
    per_row = c_pad * (2 * itemsize + 12)
    t = min(target // max(1, c_pad * itemsize),
            max(0, vmem_limit - (2 << 20)) // max(1, per_row))
    t = max(8, (t // 8) * 8)
    rows_ceil = ((n_rows + 7) // 8) * 8
    return min(t, rows_ceil)


# ---------------------------------------------------------------------------
# Kernels — spatial layout: classes on sublanes, positions on lanes
# ---------------------------------------------------------------------------

def _tile_loss(logits_ref, label_ref, *, lb_smooth, lb_ignore, num_classes, hw, t_hw):
    """Smoothed CE for one (1, C, T) block. Returns (loss, valid), each of shape (1, T)."""
    x = logits_ref[0]                               # (C, T) native dtype (no eager f32 upcast)
    lab = label_ref[0]                              # (1, T) int32

    valid = lab != lb_ignore                        # (1, T)
    if hw % t_hw != 0:
        # Ragged last tile: out-of-bounds lanes of the block hold unspecified data,
        # so force them invalid via the global position index (no jnp.pad of the logits).
        lane = jax.lax.broadcasted_iota(jnp.int32, lab.shape, 1)
        valid = jnp.logical_and(valid, pl.program_id(1) * t_hw + lane < hw)
    tgt = jnp.where(valid, lab, 0)                  # (1, T)

    lb_pos = 1.0 - lb_smooth
    lb_neg = lb_smooth / num_classes
    coeff = (num_classes - 1) * lb_neg + lb_pos

    # Stable logsumexp with the max term algebraically cancelled against the
    # smoothed-label dot product (saves one full (C,T) multiply + the m re-add).
    m = jnp.max(x, axis=0, keepdims=True)                                # (1, T) XLU, native dtype
    xm = (x - m).astype(jnp.float32)                                     # upcast only for exp/accum
    sum_e = jnp.sum(jnp.exp(xm), axis=0, keepdims=True)                  # (1, T) EUP + XLU
    sum_xm = jnp.sum(xm, axis=0, keepdims=True)                          # (1, T) XLU
    cls = jax.lax.broadcasted_iota(jnp.int32, x.shape, 0)                # (C, T)
    xm_tgt = jnp.sum(jnp.where(cls == tgt, xm, 0.0), axis=0, keepdims=True)

    loss = coeff * jnp.log(sum_e) - lb_neg * sum_xm - (lb_pos - lb_neg) * xm_tgt
    loss = jnp.where(valid, loss, 0.0)              # ignored / out-of-bounds positions -> 0
    return loss, valid


def _lsr_ce_none_kernel(logits_ref, label_ref, loss_ref, **kw):
    loss, _ = _tile_loss(logits_ref, label_ref, **kw)
    loss_ref[0] = loss                              # (1, T) lane-dense store


def _lsr_ce_partial_kernel(logits_ref, label_ref, part_ref, **kw):
    loss, valid = _tile_loss(logits_ref, label_ref, **kw)
    tile_loss = jnp.sum(loss)                       # scalar per tile
    tile_valid = jnp.sum(valid.astype(jnp.float32))
    row = jax.lax.broadcasted_iota(jnp.int32, (2, 128), 0)
    lane = jax.lax.broadcasted_iota(jnp.int32, (2, 128), 1)
    # lane 0 of row 0 = partial loss sum; lane 0 of row 1 = partial valid count
    part_ref[0] = jnp.where(lane == 0, jnp.where(row == 0, tile_loss, tile_valid), 0.0)


# ---------------------------------------------------------------------------
# Kernel — 2-D classification layout: rows on sublanes, classes on lanes
# (avoids the previous wrapper-side transpose copy of the logits)
# ---------------------------------------------------------------------------

def _lsr_ce_rows_kernel(logits_ref, label_ref, loss_ref, valid_ref, *, lb_smooth,
                        lb_ignore, num_classes, n_rows, t_rows):
    x = logits_ref[...]                             # (TB, C) native dtype
    lab = label_ref[...]                            # (TB, 1) int32

    valid = lab != lb_ignore
    if n_rows % t_rows != 0:
        ridx = jax.lax.broadcasted_iota(jnp.int32, lab.shape, 0)
        valid = jnp.logical_and(valid, pl.program_id(0) * t_rows + ridx < n_rows)
    tgt = jnp.where(valid, lab, 0)

    lb_pos = 1.0 - lb_smooth
    lb_neg = lb_smooth / num_classes
    coeff = (num_classes - 1) * lb_neg + lb_pos

    m = jnp.max(x, axis=1, keepdims=True)           # (TB, 1) XLU lane-reduce
    xm = (x - m).astype(jnp.float32)
    sum_e = jnp.sum(jnp.exp(xm), axis=1, keepdims=True)
    sum_xm = jnp.sum(xm, axis=1, keepdims=True)
    cls = jax.lax.broadcasted_iota(jnp.int32, x.shape, 1)
    xm_tgt = jnp.sum(jnp.where(cls == tgt, xm, 0.0), axis=1, keepdims=True)

    loss = coeff * jnp.log(sum_e) - lb_neg * sum_xm - (lb_pos - lb_neg) * xm_tgt
    loss = jnp.where(valid, loss, 0.0)              # (TB, 1)
    loss_ref[...] = loss
    valid_ref[...] = valid.astype(jnp.float32)


# ---------------------------------------------------------------------------
# Wrapper
# ---------------------------------------------------------------------------

def _lsr_ce_rows(logits, label, lb_smooth, reduction, lb_ignore, itemsize, vmem_limit):
    B, C = logits.shape
    c_pad = ((C + 127) // 128) * 128
    if c_pad * (2 * itemsize + 12) * 8 + (2 << 20) > vmem_limit:
        # TODO(synk): vocab-scale C needs a class-chunked grid axis with an online-logsumexp
        # accumulator (plus MXU ones-matmul class sums); fall back to XLA for now.
        return _reference_loss(logits, label, lb_smooth, reduction, lb_ignore)

    t_rows = _choose_row_tile(C, B, itemsize, vmem_limit)
    lab2 = label.reshape(B, 1).astype(jnp.int32)

    kernel = functools.partial(_lsr_ce_rows_kernel, lb_smooth=lb_smooth,
                               lb_ignore=lb_ignore, num_classes=C,
                               n_rows=B, t_rows=t_rows)
    loss_col, valid_col = pl.pallas_call(
        kernel,
        out_shape=(jax.ShapeDtypeStruct((B, 1), jnp.float32),
                   jax.ShapeDtypeStruct((B, 1), jnp.float32)),
        grid_spec=pltpu.PrefetchScalarGridSpec(
            num_scalar_prefetch=0,
            grid=(pl.cdiv(B, t_rows),),
            in_specs=[pl.BlockSpec((t_rows, C), lambda b: (b, 0)),
                      pl.BlockSpec((t_rows, 1), lambda b: (b, 0))],
            out_specs=[pl.BlockSpec((t_rows, 1), lambda b: (b, 0)),
                       pl.BlockSpec((t_rows, 1), lambda b: (b, 0))],
        ),
        compiler_params=pltpu.CompilerParams(
            dimension_semantics=("parallel",),
            vmem_limit_bytes=vmem_limit,
        ),
    )(logits, lab2)

    loss = loss_col[:, 0]
    if reduction == "sum":
        return loss.sum()
    if reduction == "mean":
        return loss.sum() / valid_col[:, 0].sum()
    return loss


def lsr_cross_entropy_loss_v2(logits, label, *, lb_smooth=0.1, reduction="mean",
                              lb_ignore=-100):
    """Forward pass of LSRCrossEntropyLossV2. logits: (N, C, *spatial) or (B, C); label matches."""
    C = logits.shape[1]
    itemsize = jnp.dtype(logits.dtype).itemsize
    vmem_limit = _vmem_limit_bytes()

    if logits.ndim == 2:
        return _lsr_ce_rows(logits, label, lb_smooth, reduction, lb_ignore,
                            itemsize, vmem_limit)

    spatial = logits.shape[2:]
    N = logits.shape[0]
    HW = 1
    for d in spatial:
        HW *= d

    c_pad = ((C + 7) // 8) * 8
    if c_pad * (2 * itemsize + 12) * 128 + (2 << 20) > vmem_limit:
        # TODO(synk): vocab-scale C needs a class-chunked 'arbitrary' grid axis with an
        # online-logsumexp accumulator; fall back to XLA for now to avoid a VMEM OOM.
        return _reference_loss(logits, label, lb_smooth, reduction, lb_ignore)

    x3 = logits.reshape(N, C, HW)                       # free reshape, native dtype (no pad)
    lab3 = label.reshape(N, 1, HW).astype(jnp.int32)    # no pad: ragged tile masked in-kernel

    t_hw = _choose_spatial_tile(C, HW, itemsize, vmem_limit)
    n_s = pl.cdiv(HW, t_hw)

    in_specs = [
        pl.BlockSpec((1, C, t_hw), lambda n, s: (n, 0, s)),   # class on sublanes, positions on lanes
        pl.BlockSpec((1, 1, t_hw), lambda n, s: (n, 0, s)),
    ]
    compiler_params = pltpu.CompilerParams(
        dimension_semantics=("parallel", "parallel"),         # no resident accumulator
        vmem_limit_bytes=vmem_limit,
    )

    if reduction in ("mean", "sum"):
        kernel = functools.partial(_lsr_ce_partial_kernel, lb_smooth=lb_smooth,
                                   lb_ignore=lb_ignore, num_classes=C, hw=HW, t_hw=t_hw)
        partials = pl.pallas_call(
            kernel,
            out_shape=jax.ShapeDtypeStruct((N, 2, n_s * 128), jnp.float32),
            grid_spec=pltpu.PrefetchScalarGridSpec(
                num_scalar_prefetch=0,
                grid=(N, n_s),
                in_specs=in_specs,
                out_specs=pl.BlockSpec((1, 2, 128), lambda n, s: (n, 0, s)),
            ),
            compiler_params=compiler_params,
        )(x3, lab3)
        sums = jnp.sum(partials, axis=(0, 2))               # (2,) = [loss_sum, n_valid]
        if reduction == "sum":
            return sums[0]
        return sums[0] / sums[1]

    # reduction == 'none' (or anything else, matching the PyTorch fall-through)
    # TODO(synk): for tiny C with bf16 inputs the loss could be emitted in bf16 to shave
    # output-write traffic if downstream tolerates it; kept f32 here.
    kernel = functools.partial(_lsr_ce_none_kernel, lb_smooth=lb_smooth,
                               lb_ignore=lb_ignore, num_classes=C, hw=HW, t_hw=t_hw)
    loss = pl.pallas_call(
        kernel,
        out_shape=jax.ShapeDtypeStruct((N, 1, HW), jnp.float32),
        grid_spec=pltpu.PrefetchScalarGridSpec(
            num_scalar_prefetch=0,
            grid=(N, n_s),
            in_specs=in_specs,
            out_specs=pl.BlockSpec((1, 1, t_hw), lambda n, s: (n, 0, s)),
        ),
        compiler_params=compiler_params,
    )(x3, lab3)
    return loss.reshape((N,) + spatial)


# ---------------------------------------------------------------------------
# Pure-JAX reference (mirrors the PyTorch forward); also used as the large-C fallback
# ---------------------------------------------------------------------------

def _reference_loss(logits, label, lb_smooth, reduction, lb_ignore):
    C = logits.shape[1]
    valid = label != lb_ignore
    tgt = jnp.where(valid, label, 0)
    lb_pos, lb_neg = 1.0 - lb_smooth, lb_smooth / C
    onehot = jax.nn.one_hot(tgt, C, axis=1, dtype=jnp.float32)       # (N, C, *spatial)
    smooth = lb_neg + (lb_pos - lb_neg) * onehot
    smooth = smooth * jnp.expand_dims(valid, 1).astype(jnp.float32)  # zero ignored columns
    logp = jax.nn.log_softmax(logits.astype(jnp.float32), axis=1)
    loss = -(logp * smooth).sum(axis=1)                              # (N, *spatial)
    if reduction == "mean":
        return loss.sum() / valid.sum()
    if reduction == "sum":
        return loss.sum()
    return loss


if __name__ == "__main__":
    key = jax.random.PRNGKey(0)
    k1, k2, k3, k4, k5 = jax.random.split(key, 5)

    # 4-D segmentation-style case; HW = 16*15 = 240 exercises the ragged (masked) last tile.
    N, C, H, W = 2, 4, 16, 15
    logits = jax.random.normal(k1, (N, C, H, W), dtype=jnp.float32)
    label = jax.random.randint(k2, (N, H, W), 0, C, dtype=jnp.int32)
    ignore_mask = jax.random.uniform(k3, (N, H, W)) < 0.15
    label = jnp.where(ignore_mask, -100, label)

    for red in ("mean", "sum", "none"):
        out = jax.block_until_ready(
            lsr_cross_entropy_loss_v2(logits, label, lb_smooth=0.1,
                                      reduction=red, lb_ignore=-100))
        ref = _reference_loss(logits, label, 0.1, red, -100)
        assert jnp.allclose(out, ref, atol=1e-4, rtol=1e-5), (red, out, ref)

    # 2-D pure-classification case (no transpose copy; classes on lanes, ragged row tile).
    B2, C2 = 50, 10
    logits2 = jax.random.normal(k4, (B2, C2), dtype=jnp.float32)
    label2 = jax.random.randint(k5, (B2,), 0, C2, dtype=jnp.int32)
    label2 = label2.at[::7].set(-100)

    for red in ("mean", "none"):
        out = jax.block_until_ready(
            lsr_cross_entropy_loss_v2(logits2, label2, lb_smooth=0.1,
                                      reduction=red, lb_ignore=-100))
        ref = _reference_loss(logits2, label2, 0.1, red, -100)
        assert jnp.allclose(out, ref, atol=1e-4, rtol=1e-5), (red, out, ref)

    print("KERNEL_OK")
</pallas_src>

<mosaic_0001>
module attributes {stable_mosaic.version = 11 : i64} {
  func.func @_lsr_ce_partial_kernel(%arg0: i32, %arg1: i32, %arg2: memref<1x4x256xf32, #tpu.memory_space<vmem>>, %arg3: memref<1x1x256xi32, #tpu.memory_space<vmem>>, %arg4: memref<1x2x128xf32, #tpu.memory_space<vmem>>) attributes {dimension_semantics = [#tpu.dimension_semantics<parallel>, #tpu.dimension_semantics<parallel>], iteration_bounds = array<i64: 2, 1>, scalar_prefetch = 0 : i64, scratch_operands = 0 : i64, tpu.core_type = #tpu.core_type<tc>, window_params = [{transform_indices = @transform_0, window_bounds = array<i64: 1, 4, 256>}, {transform_indices = @transform_1, window_bounds = array<i64: 1, 1, 256>}, {transform_indices = @transform_2, window_bounds = array<i64: 1, 2, 128>}]} {
    %c0 = arith.constant 0 : index
    %c0_0 = arith.constant 0 : index
    %c0_1 = arith.constant 0 : index
    %0 = vector.load %arg2[%c0, %c0_0, %c0_1] : memref<1x4x256xf32, #tpu.memory_space<vmem>>, vector<1x4x256xf32>
    %1 = vector.shape_cast %0 : vector<1x4x256xf32> to vector<4x256xf32>
    %c0_2 = arith.constant 0 : index
    %c0_3 = arith.constant 0 : index
    %c0_4 = arith.constant 0 : index
    %2 = vector.load %arg3[%c0_2, %c0_3, %c0_4] : memref<1x1x256xi32, #tpu.memory_space<vmem>>, vector<1x1x256xi32>
    %3 = vector.shape_cast %2 : vector<1x1x256xi32> to vector<1x256xi32>
    %c-100_i32 = arith.constant -100 : i32
    %4 = vector.broadcast %c-100_i32 : i32 to vector<1x256xi32>
    %5 = arith.cmpi ne, %3, %4 : vector<1x256xi32>
    %6 = tpu.iota {dimensions = array<i32: 1>} : vector<1x256xi32>
    %c256_i32 = arith.constant 256 : i32
    %7 = arith.muli %arg1, %c256_i32 : i32
    %8 = vector.broadcast %7 : i32 to vector<1x256xi32>
    %9 = arith.addi %8, %6 : vector<1x256xi32>
    %c240_i32 = arith.constant 240 : i32
    %10 = vector.broadcast %c240_i32 : i32 to vector<1x256xi32>
    %11 = arith.cmpi slt, %9, %10 : vector<1x256xi32>
    %12 = arith.andi %5, %11 : vector<1x256xi1>
    %c0_i32 = arith.constant 0 : i32
    %13 = vector.broadcast %c0_i32 : i32 to vector<1x256xi32>
    %14 = arith.select %12, %3, %13 : vector<1x256xi1>, vector<1x256xi32>
    %cst = arith.constant dense<0xFF800000> : vector<256xf32>
    %15 = vector.multi_reduction <maximumf>, %1, %cst [0] : vector<4x256xf32> to vector<256xf32>
    %16 = vector.shape_cast %15 : vector<256xf32> to vector<1x256xf32>
    %17 = vector.broadcast %16 : vector<1x256xf32> to vector<4x256xf32>
    %18 = arith.subf %1, %17 : vector<4x256xf32>
    %19 = math.exp %18 : vector<4x256xf32>
    %cst_5 = arith.constant dense<0.000000e+00> : vector<256xf32>
    %20 = vector.multi_reduction <add>, %19, %cst_5 [0] : vector<4x256xf32> to vector<256xf32>
    %21 = vector.shape_cast %20 : vector<256xf32> to vector<1x256xf32>
    %cst_6 = arith.constant dense<0.000000e+00> : vector<256xf32>
    %22 = vector.multi_reduction <add>, %18, %cst_6 [0] : vector<4x256xf32> to vector<256xf32>
    %23 = vector.shape_cast %22 : vector<256xf32> to vector<1x256xf32>
    %24 = tpu.iota {dimensions = array<i32: 0>} : vector<4x256xi32>
    %25 = vector.broadcast %14 : vector<1x256xi32> to vector<4x256xi32>
    %26 = arith.cmpi eq, %24, %25 : vector<4x256xi32>
    %cst_7 = arith.constant 0.000000e+00 : f32
    %27 = vector.broadcast %cst_7 : f32 to vector<4x256xf32>
    %28 = arith.select %26, %18, %27 : vector<4x256xi1>, vector<4x256xf32>
    %cst_8 = arith.constant dense<0.000000e+00> : vector<256xf32>
    %29 = vector.multi_reduction <add>, %28, %cst_8 [0] : vector<4x256xf32> to vector<256xf32>
    %30 = vector.shape_cast %29 : vector<256xf32> to vector<1x256xf32>
    %31 = math.log %21 : vector<1x256xf32>
    %cst_9 = arith.constant 9.750000e-01 : f32
    %32 = vector.broadcast %cst_9 : f32 to vector<1x256xf32>
    %33 = arith.mulf %32, %31 : vector<1x256xf32>
    %cst_10 = arith.constant 2.500000e-02 : f32
    %34 = vector.broadcast %cst_10 : f32 to vector<1x256xf32>
    %35 = arith.mulf %34, %23 : vector<1x256xf32>
    %36 = arith.subf %33, %35 : vector<1x256xf32>
    %cst_11 = arith.constant 8.750000e-01 : f32
    %37 = vector.broadcast %cst_11 : f32 to vector<1x256xf32>
    %38 = arith.mulf %37, %30 : vector<1x256xf32>
    %39 = arith.subf %36, %38 : vector<1x256xf32>
    %cst_12 = arith.constant 0.000000e+00 : f32
    %40 = vector.broadcast %cst_12 : f32 to vector<1x256xf32>
    %41 = arith.select %12, %39, %40 : vector<1x256xi1>, vector<1x256xf32>
    %42 = vector.shape_cast %41 : vector<1x256xf32> to vector<1x1x256xf32>
    %cst_13 = arith.constant dense<0.000000e+00> : vector<1xf32>
    %43 = vector.multi_reduction <add>, %42, %cst_13 [1, 2] : vector<1x1x256xf32> to vector<1xf32>
    %44 = vector.shape_cast %43 : vector<1xf32> to vector<1x1x1xf32>
    %45 = vector.extract %44[0, 0, 0] : f32 from vector<1x1x1xf32>
    %46 = arith.extui %12 : vector<1x256xi1> to vector<1x256xi32>
    %47 = arith.sitofp %46 : vector<1x256xi32> to vector<1x256xf32>
    %48 = vector.shape_cast %47 : vector<1x256xf32> to vector<1x1x256xf32>
    %cst_14 = arith.constant dense<0.000000e+00> : vector<1xf32>
    %49 = vector.multi_reduction <add>, %48, %cst_14 [1, 2] : vector<1x1x256xf32> to vector<1xf32>
    %50 = vector.shape_cast %49 : vector<1xf32> to vector<1x1x1xf32>
    %51 = vector.extract %50[0, 0, 0] : f32 from vector<1x1x1xf32>
    %52 = tpu.iota {dimensions = array<i32: 0>} : vector<2x128xi32>
    %53 = tpu.iota {dimensions = array<i32: 1>} : vector<2x128xi32>
    %c0_i32_15 = arith.constant 0 : i32
    %54 = vector.broadcast %c0_i32_15 : i32 to vector<2x128xi32>
    %55 = arith.cmpi eq, %53, %54 : vector<2x128xi32>
    %c0_i32_16 = arith.constant 0 : i32
    %56 = vector.broadcast %c0_i32_16 : i32 to vector<2x128xi32>
    %57 = arith.cmpi eq, %52, %56 : vector<2x128xi32>
    %58 = vector.broadcast %45 : f32 to vector<2x128xf32>
    %59 = vector.broadcast %51 : f32 to vector<2x128xf32>
    %60 = arith.select %57, %58, %59 : vector<2x128xi1>, vector<2x128xf32>
    %cst_17 = arith.constant 0.000000e+00 : f32
    %61 = vector.broadcast %cst_17 : f32 to vector<2x128xf32>
    %62 = arith.select %55, %60, %61 : vector<2x128xi1>, vector<2x128xf32>
    %c0_18 = arith.constant 0 : index
    %c0_19 = arith.constant 0 : index
    %c0_20 = arith.constant 0 : index
    %63 = vector.load %arg4[%c0_18, %c0_19, %c0_20] : memref<1x2x128xf32, #tpu.memory_space<vmem>>, vector<1x2x128xf32>
    %64 = vector.shape_cast %63 : vector<1x2x128xf32> to vector<2x128xf32>
    %65 = vector.shape_cast %62 : vector<2x128xf32> to vector<1x2x128xf32>
    tpu.vector_store %arg4[%c0_18, %c0_19, %c0_20], %65 {strides = array<i32>} : memref<1x2x128xf32, #tpu.memory_space<vmem>>, vector<1x2x128xf32>,
    return
  }
  func.func @transform_0(%arg0: i32, %arg1: i32) -> (i32, i32, i32) {
    %c0_i32 = arith.constant 0 : i32
    %c0_i32_0 = arith.constant 0 : i32
    return %arg0, %c0_i32, %arg1 : i32, i32, i32
  }
  func.func @transform_1(%arg0: i32, %arg1: i32) -> (i32, i32, i32) {
    %c0_i32 = arith.constant 0 : i32
    %c0_i32_0 = arith.constant 0 : i32
    return %arg0, %c0_i32, %arg1 : i32, i32, i32
  }
  func.func @transform_2(%arg0: i32, %arg1: i32) -> (i32, i32, i32) {
    %c0_i32 = arith.constant 0 : i32
    %c0_i32_0 = arith.constant 0 : i32
    return %arg0, %c0_i32, %arg1 : i32, i32, i32
  }
}

</mosaic_0001>

<bundles_post_ra>
// kernel: tpu_custom_call.1
= control target key start
LH: loop header
LB: loop body
LE: loop exit
PB: predicated region body
PF: predicated region fallthrough
CT: control target
= control target key end

     0   :  { %7 = vsyncpa [#allocation3], 0  ;;  %s1091_s0 = inlined_call_operand.hbm [shape: f32[2,4,240], index: 0, kind: input, shape index: {}]   ;;  %s1092_s1 = inlined_call_operand.hbm [shape: s32[2,1,240], index: 1, kind: input, shape index: {}]   ;;  %s1093_s2 = inlined_call_operand.hbm [shape: f32[2,2,128], index: 2, kind: output, shape index: {}]  }
   0x1   :  { %9 = vsyncpa [#allocation3 + $0x1], 0 }
   0x2   :  { %10 = vsyncpa [#allocation6], 0 }
   0x3   :  { %12 = vsyncpa [#allocation6 + $0x1], 0 }
   0x4   :  { %13 = vsyncpa [#allocation4], 0 }
   0x5   :  { %15 = vsyncpa [#allocation4 + $0x1], 0  ;;  %s826_s9 = smov 0   ;;  %s828_s10 = smov 0  }
   0x6   :  { %s830_s11 = smov 0   ;;  %s832_s12 = smov 0  }
   0x7   :  { %s834_s13 = smov 0   ;;  %s836_s14 = smov 0  }
   0x8 LB: > { %s553_s15 = sadd.s32 4294967295, %s802_s14   ;;  %s554_s16 = sadd.s32 4294967294, %s802_s14   ;;  %s802_s14 = sphi %s836_s14, %s21_s14   ;;  %s798_s13 = sphi %s834_s13, %s1115_s13   ;;  %s794_s12 = sphi %s832_s12, %s1114_s12   ;;  %s790_s11 = sphi %s830_s11, %s1113_s11   ;;  %s786_s10 = sphi %s828_s10, %s1112_s10   ;;  %s782_s9 = sphi %s826_s9, %s1111_s9  }
   0x9   : > { %s33_s17 = sadd.s32 1, %s798_s13  ;;  %s42_s18 = sadd.s32 1, %s790_s11 }
   0xa   : > { %p35_p0 = scmp.ge.s32.totalorder %s33_s17, 2  ;;  %p49_p1 = scmp.ne.s32.totalorder %s790_s11, %s786_s10 }
   0xb   : > { %p50_p2 = scmp.eq.s32.totalorder %s802_s14, 0  ;;  %p55_p3 = scmp.ne.s32.totalorder %s786_s10, %s782_s9 }
   0xc   : > { %s1117_s17 = smov (%p35_p0, %s33_s17), 0  ;;  %p56_p5 = scmp.eq.s32.totalorder %s553_s15, 0 }
   0xd   : > { %p867_p4 = por %p50_p2, %p49_p1  ;;  %s37_s20 = ssub.s32 %s798_s13, %s1117_s17 }
   0xe   : > { %p109_p6 = scmp.eq.s32.totalorder %s553_s15, 1  ;;  %p40_p7 = scmp.eq.s32.totalorder %s37_s20, 0 }
   0xf   : > { %p873_p8 = por %p56_p5, %p55_p3  ;;  %p115_p10 = scmp.eq.s32.totalorder %s554_s16, 1 }
  0x10   : > { %p877_p9 = por %p109_p6, %p49_p1  ;;  %p595_p13 = scmp.lt.s32.totalorder %s802_s14, 2 }
  0x11   : > { %s1097_s21 = scalar_select %p873_p8, 1, 0 }
  0x12   : > { %s1098_s22 = scalar_select %p877_p9, 1, 0 }
  0x13   : > { %s882_s23 = scalar_select %p40_p7, %s790_s11, %s42_s18  }
  0x14   : > { %p884_p11 = por %p115_p10, %p55_p3  ;;  %s891_s25 = sand.u32 1, %s790_s11  }
  0x15   : > { %s557_s26 = sshll.u32 %s891_s25, 3  ;;  %s572_s27 = sshll.u32 %s798_s13, 7 }
  0x16   : > { %s1099_s24 = scalar_select %p884_p11, 1, 0 }
  0x17   : > { %s898_s30 = scalar_lea.hbm %s1091_s0, %s572_s27  ;;  %s139_s3 = scalar_lea.vmem [#allocation2], %s557_s26 }
  0x18   : > { %s149_s4 = sshll.u32 %s139_s3, 4  ;;  %p904_p0 = pnand %p595_p13, %p867_p4  ;;  %s900_s4 = int_to_ptr.vmem [resolvable:$true] %s149_s4 }
  0x19   : > { %s136_s6 = scalar_lea.sflag [#allocation3], %s891_s25  ;;  %s656_s7 = scalar_lea.hbm %s898_s30, 128 }
  0x1a   : > { %p657_p3 = scmp.ne.s32.totalorder %s898_s30, %s656_s7  ;;  %p658_p5 = pneg %p904_p0 }
  0x1b   : > { %s661_s16 = scalar_lea.hbm %s1091_s0, 256  ;;  %p662_p4 = scmp.lt.u32.totalorder %s898_s30, %s1091_s0 }
  0x1c   : > { %p659_p6 = pnand %p658_p5, %p657_p3  ;;  %p663_p10 = scmp.lt.u32.totalorder %s661_s16, %s656_s7 }
  0x1d   : > { %p665_p12 = scmp.lt.u32.totalorder %s656_s7, %s898_s30 }
  0x1e   : > { %p660_p7 = pneg %p659_p6  ;;  %p664_p13 = por %p663_p10, %p662_p4 }
  0x20   : > { %p666_p1 = por %p665_p12, %p664_p13 }
  0x22   : > { %p667_p2 = pnand %p666_p1, %p660_p7 }
  0x24   : > { %670 = shalt.err (!%p667_p2)
}
  0x25   : > { %s671_s20 = scalar_lea.vmem %s900_s4, 128  ;;  %s804_s26 = smov [#allocation2]  }
  0x26   : > { %p672_p3 = scmp.ne.s32.totalorder %s900_s4, %s671_s20  ;;  %s676_s27 = sshll.u32 %s804_s26, 4  ;;  %s677_s27 = int_to_ptr.vmem [resolvable:$false] %s676_s27 }
  0x27   : > { %s678_s28 = scalar_lea.vmem %s677_s27, 256  ;;  %p679_p9 = scmp.lt.s32.totalorder %s900_s4, %s677_s27 }
  0x28   : > { %p674_p6 = pnand %p672_p3, %p658_p5  ;;  %p680_p4 = scmp.lt.s32.totalorder %s678_s28, %s671_s20 }
  0x2a   : > { %p675_p11 = pneg %p674_p6  ;;  %p681_p10 = por %p680_p4, %p679_p9 }
  0x2c   : > { %p682_p12 = pnand %p681_p10, %p675_p11 }
  0x2e   : > { %685 = shalt.err (!%p682_p12)
}
  0x2f   : > { %587 = dma.hbm_to_vmem [thread:$0]  (!%p904_p0), %s898_s30, 128, %s900_s4, %s136_s6  }
  0x30   : > { %p1101_p1 = scmp.lt.s32.totalorder %s802_s14, 3  ;;  %p1102_p2 = scmp.ge.s32.totalorder %s802_s14, 1 }
  0x31   : > { %s560_s3 = sshll.u32 %s891_s25, 1  ;;  %s573_s7 = sshll.u32 %s798_s13, 5 }
  0x32   : > { %p940_p7 = pnand %p1102_p2, %p1101_p1  ;;  %s949_s16 = scalar_lea.hbm %s1092_s1, %s573_s7 }
  0x33   : > { %s160_s18 = scalar_lea.vmem [#allocation5], %s560_s3  ;;  %s157_s30 = scalar_lea.sflag [#allocation6], %s891_s25 }
  0x34   : > { %s1103_s29 = scalar_select %p940_p7, 1, 0 }
  0x35   : > { %s170_s19 = sshll.u32 %s160_s18, 4  ;;  %s686_s4 = scalar_lea.hbm %s949_s16, 32  ;;  %s171_s19 = int_to_ptr.vmem [resolvable:$true] %s170_s19 }
  0x36   : > { %p687_p9 = scmp.ne.s32.totalorder %s949_s16, %s686_s4  ;;  %s691_s26 = scalar_lea.hbm %s1092_s1, 64 }
  0x37   : > { %p692_p3 = scmp.lt.u32.totalorder %s949_s16, %s1092_s1  ;;  %p693_p6 = scmp.lt.u32.totalorder %s691_s26, %s686_s4 }
  0x38   : > { %p689_p11 = pnand %p687_p9, %p658_p5  ;;  %p695_p10 = scmp.lt.u32.totalorder %s686_s4, %s949_s16 }
  0x39   : > { %p694_p4 = por %p693_p6, %p692_p3 }
  0x3a   : > { %p690_p13 = pneg %p689_p11 }
  0x3b   : > { %p696_p12 = por %p695_p10, %p694_p4 }
  0x3d   : > { %p697_p1 = pnand %p696_p12, %p690_p13 }
  0x3f   : > { %700 = shalt.err (!%p697_p1)
}
  0x40   : > { %s701_s25 = scalar_lea.vmem %s171_s19, 32  ;;  %s805_s3 = smov [#allocation5]  }
  0x41   : > { %p702_p2 = scmp.ne.s32.totalorder %s171_s19, %s701_s25  ;;  %s706_s7 = sshll.u32 %s805_s3, 4  ;;  %s707_s7 = int_to_ptr.vmem [resolvable:$false] %s706_s7 }
  0x42   : > { %s708_s8 = scalar_lea.vmem %s707_s7, 64  ;;  %p709_p8 = scmp.lt.s32.totalorder %s171_s19, %s707_s7 }
  0x43   : > { %p704_p9 = pnand %p702_p2, %p658_p5  ;;  %p710_p7 = scmp.lt.s32.totalorder %s708_s8, %s701_s25 }
  0x45   : > { %p705_p11 = pneg %p704_p9  ;;  %p711_p3 = por %p710_p7, %p709_p8 }
  0x47   : > { %p712_p6 = pnand %p711_p3, %p705_p11 }
  0x49   : > { %715 = shalt.err (!%p712_p6)
}
  0x4a   : > { %590 = dma.hbm_to_vmem [thread:$0]  (!%p904_p0), %s949_s16, 32, %s171_s19, %s157_s30  }
  0x4b   : > { %p1104_p13 = scmp.ne.s32.totalorder %s1103_s29, 0 }
  0x4c   : > { %s974_s15 = sand.u32 (!%p1104_p13), 1, %s786_s10   ;;  %p1105_p5 = scmp.ne.s32.totalorder (!%p1104_p13), %s1097_s21, 0 }
  0x4d   : > { %179 = sbr.rel (%p1104_p13) target bundleno = 392 (0x188), region = 28  ;;  %s564_s18 = sshll.u32 (!%p1104_p13), %s974_s15, 3 }
  0x4e   : > { %s182_s4 = scalar_lea.sflag (!%p1104_p13), [#allocation3], %s974_s15  ;;  %s185_s6 = scalar_lea.vmem (!%p1104_p13), [#allocation2], %s564_s18 }
  0x54   : > { %769 = dma.done.wait (%p1105_p5), %s182_s4, 128  }
  0x55   : > { %771 = vsyncadd (%p1105_p5), %s182_s4, 4294967168  ;;  %s565_s5 = sshll.u32 %s974_s15, 1  ;;  %s191_s29 = scalar_lea.sflag [#allocation6], %s974_s15 }
  0x56   : > { %s194_s16 = scalar_lea.vmem [#allocation5], %s565_s5 }
  0x57   : > { %773 = dma.done.wait (%p1105_p5), %s191_s29, 32  }
  0x58   : > { %775 = vsyncadd (%p1105_p5), %s191_s29, 4294967264  ;;  %v225_v0 = vlaneseq  ;;  %v806_v1 = vmov 1966171168   ;;  %vm257_vm0 = vcmask 1043456   ;;  %v222_v7 = vld [vmem:[%s185_s6] sm:$0xff]  ;;  %v807_v8 = vmov 0  }
  0x59   : > { %v238_v2 = vunpack.c.l.s4 %v806_v1  ;;  %v808_v11 = vmov 1   ;;  %v255_v13 = vcombine.high %v222_v7, %v222_v7  ;;  %v258_v14 = vsel %vm257_vm0, %v222_v7, -inf  ;;  %v223_v25 = vld [vmem:[%s194_s16] sm:$0x3]  ;;  %s569_s19 = sshll.u32 %s794_s12, 5  ;;  %s219_s30 = scalar_lea.vmem [#allocation7], %s565_s5 }
  0x5a   : > { %v990_v3 = vand.u32 127, %v225_v0  ;;  %v992_v5 = vshrl.u32 %v225_v0, 7  ;;  %v259_v15 = vrot.slane %v258_v14, 4  ;;  %vm224_vm2 = vcmp.ne.s32.totalorder %v223_v25, 4294967196  ;;  %s445_s20 = sshll.u32 %s219_s30, 4  ;;  %s1042_s25 = scalar_lea.hbm %s1093_s2, %s569_s19  ;;  %s1044_s20 = int_to_ptr.vmem [resolvable:$true] %s445_s20 }
  0x5b   : > { %v239_v4 = vunpack.c.0.s8 %v238_v2  ;;  %v265_v16 = vsel %vm257_vm0, %v255_v13, -inf  ;;  %vm385_vm7 = vcmask 1040384   ;;  %s431_s12 = scalar_lea.sflag [#allocation4], %s974_s15  ;;  %s716_s3 = scalar_lea.vmem %s1044_s20, 32 }
  0x5c   : > { %v227_v6 = vadd.s32 128, %v990_v3  ;;  %v260_v18 = vmax.f32 %v258_v14, %v259_v15  ;;  %v266_v19 = vrot.slane %v265_v16, 4  ;;  %v1007_v33 = vsub.s32 0, %v992_v5  ;;  %p717_p8 = scmp.ne.s32.totalorder %s1044_s20, %s716_s3  ;;  %p1108_p0 = scmp.ne.s32.totalorder %s1098_s22, 0 }
  0x5d   : > { %v996_v10 = vsub.s32 %v239_v4, %v992_v5  ;;  %v1012_v37 = vsub.s32 1, %v992_v5  ;;  %vm424_vm8 = vcmp.eq.s32.totalorder %v992_v5, 0  ;;  %vm423_vm9 = vcmp.eq.s32.totalorder %v990_v3, 0  ;;  %s810_s7 = smov [#allocation7]  }
  0x5e   : > { %vm233_vm1 = vcmp.lt.s32.totalorder %v227_v6, 240  ;;  %v261_v20 = vrot.slane %v260_v18, 2  ;;  %v267_v21 = vmax.f32 %v265_v16, %v266_v19  ;;  %p718_p7 = pnand %p717_p8, %p1108_p0  ;;  %s720_s8 = sshll.u32 %s810_s7, 4  ;;  %s721_s8 = int_to_ptr.vmem [resolvable:$false] %s720_s8 }
  0x5f   : > { %v235_v9 = vsel %vm233_vm1, 1, %v807_v8  ;;  %s722_s18 = scalar_lea.vmem %s721_s8, 64  ;;  %p723_p10 = scmp.lt.s32.totalorder %s1044_s20, %s721_s8 }
  0x60   : > { %v236_v12 = vcombine.low %v808_v11, %v235_v9  ;;  %v262_v23 = vmax.f32 %v260_v18, %v261_v20  ;;  %v268_v24 = vrot.slane %v267_v21, 2  ;;  %p719_p4 = pneg %p718_p7  ;;  %p724_p12 = scmp.lt.s32.totalorder %s722_s18, %s716_s3 }
  0x62   : > { %v243_v17 = vrot.slane %v236_v12, %v996_v10  ;;  %v263_v26 = vrot.slane %v262_v23, 1  ;;  %v269_v27 = vmax.f32 %v267_v21, %v268_v24  ;;  %p725_p1 = por %p724_p12, %p723_p10 }
  0x64   : > { %v250_v22 = vrot.slane %v243_v17, %v996_v10  ;;  %v264_v28 = vmax.f32 %v262_v23, %v263_v26  ;;  %v270_v29 = vrot.slane %v269_v27, 1  ;;  %p726_p2 = pnand %p725_p1, %p719_p4 }
  0x66   : > { %vm251_vm3 = vcmp.ne.s32.totalorder %v250_v22, 0  ;;  %v271_v30 = vmax.f32 %v269_v27, %v270_v29 }
  0x67   : > { %vm1002_vm4 = vmand %vm224_vm2, %vm251_vm3 }
  0x68   : > { %v274_v32 = vcombine.low %v264_v28, %v271_v30  ;;  %v253_v34 = vsel %vm1002_vm4, %v223_v25, 0 }
  0x69   : > { %v318_v38 = vrot.slane %v253_v34, %v1007_v33  ;;  %v322_v39 = vrot.slane %v253_v34, %v1012_v37 }
  0x6a   : > { %v276_v35 = vsub.f32 %v222_v7, %v274_v32 }
  0x6b   : > { %vm323_vm5 = vcmp.eq.s32.totalorder %v992_v5, %v318_v38  ;;  %vm324_vm6 = vcmp.eq.s32.totalorder %v992_v5, %v322_v39 }
  0x6c   : > { %v277_v36 = vmul.f32 1.442695, %v276_v35  ;;  %v297_v40 = vcombine.high %v276_v35, %v276_v35  ;;  %v325_v41 = vsel %vm323_vm5, %v276_v35, 0.0  ;;  %v299_v42 = vsel %vm257_vm0, %v276_v35, 0.0 }
  0x6d   : > { %v327_v44 = vsel %vm257_vm0, %v325_v41, 0.0  ;;  %v300_v49 = vrot.slane %v299_v42, 4 }
  0x6e   : > { %650 = vpow2.f32 %v277_v36  ;;  %v326_v43 = vsel %vm324_vm6, %v297_v40, 0.0  ;;  %v306_v46 = vsel %vm257_vm0, %v297_v40, 0.0  ;;  %v328_v51 = vrot.slane %v327_v44, 4 }
  0x6f   : > { %v334_v52 = vsel %vm257_vm0, %v326_v43, 0.0  ;;  %v307_v54 = vrot.slane %v306_v46, 4  ;;  %v301_v57 = vadd.f32 %v300_v49, %v299_v42 }
  0x70   : > { %v335_v58 = vrot.slane %v334_v52, 4  ;;  %v329_v61 = vadd.f32 %v328_v51, %v327_v44 }
  0x71   : > { %v308_v62 = vadd.f32 %v307_v54, %v306_v46  ;;  %v302_v1 = vrot.slane %v301_v57, 2 }
  0x72   : > { %v336_v2 = vadd.f32 %v335_v58, %v334_v52  ;;  %v330_v7 = vrot.slane %v329_v61, 2 }
  0x73   : > { %v309_v8 = vrot.slane %v308_v62, 2  ;;  %v303_v12 = vadd.f32 %v302_v1, %v301_v57 }
  0x74   : > { %v337_v13 = vrot.slane %v336_v2, 2  ;;  %v331_v15 = vadd.f32 %v330_v7, %v329_v61 }
  0x75   : > { %v310_v16 = vadd.f32 %v309_v8, %v308_v62  ;;  %v304_v17 = vrot.slane %v303_v12, 1 }
  0x76   : > { %v338_v18 = vadd.f32 %v337_v13, %v336_v2  ;;  %v332_v19 = vrot.slane %v331_v15, 1 }
  0x77   : > { %v311_v20 = vrot.slane %v310_v16, 1  ;;  %v305_v21 = vadd.f32 %v304_v17, %v303_v12 }
  0x78   : > { %v651_v45 = vpop.eup %650  ;;  %v339_v22 = vrot.slane %v338_v18, 1  ;;  %v333_v23 = vadd.f32 %v332_v19, %v331_v15 }
  0x79   : > { %v280_v47 = vcombine.high %v651_v45, %v651_v45  ;;  %v282_v48 = vsel %vm257_vm0, %v651_v45, 0.0  ;;  %v312_v24 = vadd.f32 %v311_v20, %v310_v16  ;;  %v347_v28 = vmul.f32 0.025, %v305_v21 }
  0x7a   : > { %v283_v50 = vrot.slane %v282_v48, 4  ;;  %v340_v26 = vadd.f32 %v339_v22, %v338_v18  ;;  %v351_v30 = vmul.f32 0.875, %v333_v23  ;;  %v809_v45 = vmov 0.0  }
  0x7b   : > { %v289_v53 = vsel %vm257_vm0, %v280_v47, 0.0  ;;  %v348_v35 = vmul.f32 0.025, %v312_v24  ;;  %v567_v46 = vsel %vm1002_vm4, 1.0, %v809_v45 }
  0x7c   : > { %v284_v55 = vadd.f32 %v283_v50, %v282_v48  ;;  %v290_v56 = vrot.slane %v289_v53, 4  ;;  %v352_v39 = vmul.f32 0.875, %v340_v26  ;;  %v404_v48 = vrot.slane %v567_v46, %v1007_v33 }
  0x7d   : > { %v408_v49 = vrot.slane %v567_v46, %v1012_v37 }
  0x7e   : > { %v285_v59 = vrot.slane %v284_v55, 2  ;;  %v291_v60 = vadd.f32 %v290_v56, %v289_v53 }
  0x7f   : > { %v412_v56 = vsel %vm385_vm7, %v408_v49, 0.0 }
  0x80   : > { %v286_v63 = vadd.f32 %v285_v59, %v284_v55  ;;  %v292_v0 = vrot.slane %v291_v60, 2  ;;  %v411_v55 = vsel %vm385_vm7, %v404_v48, 0.0 }
  0x81   : > { %v413_v58 = vadd.f32 %v412_v56, %v411_v55 }
  0x82   : > { %v287_v4 = vrot.slane %v286_v63, 1  ;;  %v293_v6 = vadd.f32 %v292_v0, %v291_v60 }
  0x84   : > { %v288_v9 = vadd.f32 %v287_v4, %v286_v63  ;;  %v294_v11 = vrot.slane %v293_v6, 1 }
  0x86   : > { %v295_v14 = vadd.f32 %v294_v11, %v293_v6  ;;  %652 = vlog2.f32 %v288_v9 }
  0x88   : > { %654 = vlog2.f32 %v295_v14 }
  0x90   : > { %v653_v25 = vpop.eup %652 }
  0x91   : > { %v342_v27 = vmul.f32 0.6931472, %v653_v25 }
  0x92   : > { %v655_v29 = vpop.eup %654 }
  0x93   : > { %v344_v32 = vmul.f32 0.6931472, %v655_v29  ;;  %v345_v34 = vmul.f32 0.975, %v342_v27 }
  0x95   : > { %v346_v36 = vmul.f32 0.975, %v344_v32  ;;  %v349_v38 = vsub.f32 %v345_v34, %v347_v28 }
  0x97   : > { %v350_v40 = vsub.f32 %v346_v36, %v348_v35  ;;  %v353_v41 = vsub.f32 %v349_v38, %v351_v30 }
  0x99   : > { %v354_v42 = vsub.f32 %v350_v40, %v352_v39 }
  0x9b   : > { %v357_v43 = vcombine.low %v353_v41, %v354_v42 }
  0x9d   : > { %v364_v44 = vrot.slane %v357_v43, %v996_v10 }
  0x9f   : > { %v371_v47 = vrot.slane %v364_v44, %v996_v10 }
  0xa1   : > { %v373_v50 = vsel %vm1002_vm4, %v371_v47, 0.0 }
  0xa2   : > { %v378_v51 = vrot.slane %v373_v50, %v1007_v33  ;;  %v382_v52 = vrot.slane %v373_v50, %v1012_v37 }
  0xa4   : > { %v386_v53 = vsel %vm385_vm7, %v378_v51, 0.0  ;;  %v387_v54 = vsel %vm385_vm7, %v382_v52, 0.0 }
  0xa5   : > { %v388_v57 = vadd.f32 %v387_v54, %v386_v53 }
  0xa7   : > { %389 = vadd.xlane.f32.xlu0 %v388_v57 }
  0xab   : > { %414 = vadd.xlane.f32.xlu0 %v413_v58 }
 0x134   : > { %v390_v10 = vpop.xlane.xlu0 %389 }
 0x135   : > { %v391_v59 = vrot.slane %v390_v10, 4 }
 0x137   : > { %v392_v60 = vadd.f32 %v391_v59, %v390_v10 }
 0x138   : > { %v415_v61 = vpop.xlane.xlu0 %414 }
 0x139   : > { %v393_v31 = vrot.slane %v392_v60, 2  ;;  %v416_v62 = vrot.slane %v415_v61, 4 }
 0x13b   : > { %v417_v63 = vadd.f32 %v416_v62, %v415_v61  ;;  %v394_v33 = vadd.f32 %v393_v31, %v392_v60 }
 0x13d   : > { %v418_v0 = vrot.slane %v417_v63, 2  ;;  %v395_v37 = vrot.slane %v394_v33, 1 }
 0x13f   : > { %v419_v1 = vadd.f32 %v418_v0, %v417_v63  ;;  %v396_v2 = vadd.f32 %v395_v37, %v394_v33 }
 0x141   : > { %574 = vpush %v396_v2  ;;  %v420_v4 = vrot.slane %v419_v1, 1 }
 0x143   : > { %v421_v6 = vadd.f32 %v420_v4, %v419_v1 }
 0x145   : > { %576 = vpush %v421_v6 }
 0x172   : > { %s575_s21 = spop %574 }
 0x173   : > { %v425_v7 = vstv %s575_s21 }
 0x176   : > { %s577_s26 = spop %576 }
 0x177   : > { %v426_v8 = vstv %s577_s26 }
 0x178   : > { %v427_v9 = vsel %vm424_vm8, %v425_v7, %v426_v8 }
 0x179   : > { %v428_v5 = vsel %vm423_vm9, %v427_v9, 0.0 }
 0x17a   : > { %429 = vst [vmem:[%s219_s30] sm:$0x3] %v428_v5 }
 0x17b   : > { %729 = shalt.err (!%p726_p2)
}
 0x17c   : > { %s730_s15 = scalar_lea.hbm %s1042_s25, 32  ;;  %s734_s5 = scalar_lea.hbm %s1093_s2, 64 }
 0x17d   : > { %p731_p9 = scmp.ne.s32.totalorder %s1042_s25, %s730_s15  ;;  %p735_p6 = scmp.lt.u32.totalorder %s1042_s25, %s1093_s2 }
 0x17e   : > { %p736_p13 = scmp.lt.u32.totalorder %s734_s5, %s730_s15  ;;  %p738_p8 = scmp.lt.u32.totalorder %s730_s15, %s1042_s25 }
 0x17f   : > { %p732_p11 = pnand %p731_p9, %p1108_p0 }
 0x180   : > { %p737_p5 = por %p736_p13, %p735_p6 }
 0x181   : > { %p733_p3 = pneg %p732_p11 }
 0x182   : > { %p739_p7 = por %p738_p8, %p737_p5 }
 0x184   : > { %p740_p4 = pnand %p739_p7, %p733_p3 }
 0x186   : > { %743 = shalt.err (!%p740_p4)
}
 0x187   : > { %582 = dma.vmem_to_hbm [thread:$0]  (%p1108_p0), %s1044_s20, 32, %s1042_s25, %s431_s12  }
 0x188 PF: > { %s457_s21 = sand.u32 1, %s782_s9   ;;  %p1109_p10 = scmp.ne.s32.totalorder %s1099_s24, 0 }
 0x189   : > { %p1110_p12 = scmp.ge.s32.totalorder %s802_s14, 2  ;;  %s458_s19 = scalar_lea.sflag [#allocation4], %s457_s21 }
 0x18b   : > { %p592_p1 = pnand %p1110_p12, %p1109_p10 }
 0x18d   : > { %777 = dma.done.wait (!%p592_p1), %s458_s19, 32  }
 0x18e   : > { %779 = vsyncadd (!%p592_p1), %s458_s19, 4294967264  ;;  %s21_s14 = sadd.s32 1, %s802_s14   ;;  %s1111_s9 = smov %s786_s10 }
 0x18f   : > { %p18_p2 = scmp.ge.s32.totalorder %s21_s14, 4   ;;  %s1112_s10 = smov %s790_s11 }
 0x190   : > { %s1113_s11 = smov %s882_s23  ;;  %s1114_s12 = smov %s798_s13 }
 0x191   : > { %s1115_s13 = smov %s1117_s17  ;;  %20 = sbr.rel (!%p18_p2) target bundleno = 8 (0x8), region = 86 }
 0x198   :  { %463 = vsyncpa [#allocation3], 1 }
 0x199   :  { %465 = vsyncpa [#allocation3 + $0x1], 1 }
 0x19a   :  { %466 = vsyncpa [#allocation6], 1 }
 0x19b   :  { %468 = vsyncpa [#allocation6 + $0x1], 1 }
 0x19c   :  { %469 = vsyncpa [#allocation4], 1 }
 0x19d   :  { %471 = vsyncpa [#allocation4 + $0x1], 1 }

</bundles_post_ra>
